<compile_context>
chip_gen: v7x
topology: tpu7x:2x2x1
jax: 0.10.0
libtpu: 0.0.40
codegen_flags: <defaults>
</compile_context>

<pallas_src>
import functools

import jax
import jax.numpy as jnp
from jax.experimental import pallas as pl
from jax.experimental.pallas import tpu as pltpu


def _round_up(x, m):
    return ((x + m - 1) // m) * m


def multilabel_regressor_forward(x, weight, bias, *,
                                 block_m=512, block_k=512, matmul_dtype=None):
    """expit(x @ weight.T + bias) as a tiled, pipelined Pallas TPU kernel.

    x:      (B, F) activations
    weight: (O, F) torch nn.Linear weight layout
    bias:   (O,)
    """
    B, F = x.shape
    O, F2 = weight.shape
    assert F == F2, "in_features mismatch between x and weight"
    out_dtype = x.dtype

    # bf16 packs two rows per sublane -> round batch tiles to 16 in that case.
    row_mult = 16 if matmul_dtype == jnp.bfloat16 else 8

    O_pad = _round_up(O, 128)
    F_pad = _round_up(F, 128)

    # --- reduction (F) tiling: tk is a multiple of 128 that divides F_pad ---
    if F_pad <= block_k:
        nk, tk = 1, F_pad
    else:
        nk = pl.cdiv(F_pad, block_k)
        tk = _round_up(pl.cdiv(F_pad, nk), 128)
        F_pad = tk * nk

    # --- batch tiling ---
    B_pad = _round_up(B, row_mult)
    if B_pad <= block_m:
        nm, tm = 1, B_pad
    else:
        nm = pl.cdiv(B_pad, block_m)
        tm = _round_up(pl.cdiv(B_pad, nm), row_mult)
        B_pad = tm * nm
    # v7x has 2 TensorCores: make sure the "parallel" batch axis has >=2 tiles
    # whenever the (padded) batch is big enough to split.
    if nm < 2 and B_pad >= 2 * row_mult:
        nm = 2
        tm = _round_up(pl.cdiv(B_pad, 2), row_mult)
        B_pad = tm * nm

    # --- operand prep (one-time, amortized over all batch tiles) ---
    # Pre-transpose W once to (F, O) so the kernel dot needs no transpose.
    w_t = weight.T
    if matmul_dtype is not None:
        # Cast only W in the wrapper (small, reused). X is cast in-kernel.
        w_t = w_t.astype(matmul_dtype)
    if (F_pad, O_pad) != (F, O):
        w_t = jnp.pad(w_t, ((0, F_pad - F), (0, O_pad - O)))

    b_p = bias.astype(jnp.float32)
    if O_pad != O:
        b_p = jnp.pad(b_p, (0, O_pad - O))
    b_p = b_p.reshape(1, O_pad)

    x_p = x
    if (B_pad, F_pad) != (B, F):
        x_p = jnp.pad(x, ((0, B_pad - B), (0, F_pad - F)))

    # Keep the whole weight resident in VMEM (never re-streamed per batch
    # tile) as long as it is comfortably small.
    w_bytes = F_pad * O_pad * w_t.dtype.itemsize
    w_resident = (nk == 1) or (w_bytes <= 4 * 1024 * 1024)

    def _cast_x(xt):
        # In-kernel activation cast for the optional bf16 MXU path: hidden
        # under the input DMA, zero extra HBM traffic.
        return xt if matmul_dtype is None else xt.astype(matmul_dtype)

    def _sigmoid(z):
        # Exact, numerically fine: exp(-z) -> inf for very negative z and the
        # exact divide then yields the correct limit 0 (no NaN).
        return 1.0 / (1.0 + jnp.exp(-z))

    # --- kernels ---
    if nk == 1:
        # Fast path: all of F in one tile. No reduction axis, no scratch.
        def kernel(x_ref, w_ref, b_ref, out_ref):
            logits = jnp.dot(_cast_x(x_ref[...]), w_ref[...],
                             preferred_element_type=jnp.float32) + b_ref[...]
            out_ref[...] = _sigmoid(logits).astype(out_ref.dtype)

        grid = (nm,)
        in_specs = [
            pl.BlockSpec((tm, F_pad), lambda i: (i, 0)),        # X tile
            pl.BlockSpec((F_pad, O_pad), lambda i: (0, 0)),     # W (resident)
            pl.BlockSpec((1, O_pad), lambda i: (0, 0)),         # bias
        ]
        out_specs = pl.BlockSpec((tm, O_pad), lambda i: (i, 0))
        scratch_shapes = []
        dim_sem = ("parallel",)
        w_buf_bytes = w_bytes
    else:
        # General path: trailing reduction axis + resident f32 accumulator.
        def kernel(x_ref, w_ref, b_ref, out_ref, acc_ref):
            k = pl.program_id(1)

            @pl.when(k == 0)
            def _init():
                acc_ref[...] = jnp.zeros_like(acc_ref)

            if w_resident:
                start = pl.multiple_of(k * tk, 128)
                w_tile = w_ref[pl.ds(start, tk), :]
            else:
                w_tile = w_ref[...]

            acc_ref[...] += jnp.dot(_cast_x(x_ref[...]), w_tile,
                                    preferred_element_type=jnp.float32)

            @pl.when(k == pl.num_programs(1) - 1)
            def _finalize():
                logits = acc_ref[...] + b_ref[...]
                out_ref[...] = _sigmoid(logits).astype(out_ref.dtype)

        if w_resident:
            w_spec = pl.BlockSpec((F_pad, O_pad), lambda i, k: (0, 0))
            w_buf_bytes = w_bytes
        else:
            w_spec = pl.BlockSpec((tk, O_pad), lambda i, k: (k, 0))
            w_buf_bytes = tk * O_pad * w_t.dtype.itemsize

        grid = (nm, nk)
        in_specs = [
            pl.BlockSpec((tm, tk), lambda i, k: (i, k)),        # X tile
            w_spec,                                             # W
            pl.BlockSpec((1, O_pad), lambda i, k: (0, 0)),      # bias
        ]
        out_specs = pl.BlockSpec((tm, O_pad), lambda i, k: (i, 0))
        scratch_shapes = [pltpu.VMEM((tm, O_pad), jnp.float32)]
        dim_sem = ("parallel", "arbitrary")

    # --- scoped-VMEM budget (double-buffered estimate), only raise if needed ---
    x_item = x_p.dtype.itemsize
    out_item = jnp.dtype(out_dtype).itemsize
    vmem_est = (2 * tm * tk * x_item
                + 2 * w_buf_bytes
                + 2 * tm * O_pad * out_item
                + (tm * O_pad * 4 if nk > 1 else 0)
                + 2 * O_pad * 4)
    vmem_limit = None
    if vmem_est > 24 * 1024 * 1024:
        vmem_limit = min(vmem_est + 8 * 1024 * 1024, 56 * 1024 * 1024)

    out = pl.pallas_call(
        kernel,
        out_shape=jax.ShapeDtypeStruct((B_pad, O_pad), out_dtype),
        grid_spec=pltpu.PrefetchScalarGridSpec(
            num_scalar_prefetch=0,
            grid=grid,
            in_specs=in_specs,
            out_specs=out_specs,
            scratch_shapes=scratch_shapes,
        ),
        compiler_params=pltpu.CompilerParams(
            dimension_semantics=dim_sem,
            vmem_limit_bytes=vmem_limit,
        ),
    )(x_p, w_t, b_p)

    if (B_pad, O_pad) != (B, O):
        out = out[:B, :O]
    return out


# TODO(synk): the module's `_min` / `min` weight-inspection helpers and the
# base_rate logit bias init are host-side parameter utilities, not part of the
# forward pass, so they are not implemented as kernels.


def _reference(x, weight, bias):
    logits = jnp.dot(x, weight.T, precision=jax.lax.Precision.HIGHEST) + bias
    return jax.nn.sigmoid(logits)


if __name__ == "__main__":
    key = jax.random.PRNGKey(0)
    kx, kw, kb, kx2, kw2 = jax.random.split(key, 5)

    # Small shapes consistent with the module: Linear(in_features, out_classes)
    batch, in_features, out_classes = 8, 32, 16
    bound = 1.0 / (in_features ** 0.5)
    weight = jax.random.uniform(kw, (out_classes, in_features), jnp.float32,
                                minval=-bound, maxval=bound)
    bias = jax.random.uniform(kb, (out_classes,), jnp.float32,
                              minval=-bound, maxval=bound)
    X = jax.random.normal(kx, (batch, in_features), jnp.float32)

    # features tuple as in the torch module: forward unpacks (_, X, _)
    features = (None, X, None)
    _, X_in, _ = features

    fwd = functools.partial(multilabel_regressor_forward)
    out = jax.block_until_ready(fwd(X_in, weight, bias))
    ref = _reference(X_in, weight, bias)
    assert out.shape == (batch, out_classes)
    assert out.dtype == X_in.dtype
    assert jnp.allclose(out, ref, atol=1e-3, rtol=1e-3), float(
        jnp.max(jnp.abs(out - ref)))

    # Exercise the multi-k-tile (reduction-axis + resident-W) path as well.
    in_features2 = 384
    bound2 = 1.0 / (in_features2 ** 0.5)
    weight2 = jax.random.uniform(kw2, (out_classes, in_features2), jnp.float32,
                                 minval=-bound2, maxval=bound2)
    X2 = jax.random.normal(kx2, (batch, in_features2), jnp.float32)
    out2 = jax.block_until_ready(
        multilabel_regressor_forward(X2, weight2, bias, block_k=128))
    ref2 = _reference(X2, weight2, bias)
    assert out2.shape == (batch, out_classes)
    assert jnp.allclose(out2, ref2, atol=1e-3, rtol=1e-3), float(
        jnp.max(jnp.abs(out2 - ref2)))

    print("KERNEL_OK")
</pallas_src>

<mosaic_0001>
module attributes {stable_mosaic.version = 11 : i64} {
  func.func @kernel(%arg0: i32, %arg1: memref<8x128xf32, #tpu.memory_space<vmem>>, %arg2: memref<128x128xf32, #tpu.memory_space<vmem>>, %arg3: memref<1x128xf32, #tpu.memory_space<vmem>>, %arg4: memref<8x128xf32, #tpu.memory_space<vmem>>) attributes {dimension_semantics = [#tpu.dimension_semantics<parallel>], iteration_bounds = array<i64: 1>, scalar_prefetch = 0 : i64, scratch_operands = 0 : i64, tpu.core_type = #tpu.core_type<tc>, window_params = [{transform_indices = @transform_0, window_bounds = array<i64: 8, 128>}, {pipeline_mode = #tpu.pipeline_mode<synchronous>, transform_indices = @transform_1, window_bounds = array<i64: 128, 128>}, {pipeline_mode = #tpu.pipeline_mode<synchronous>, transform_indices = @transform_2, window_bounds = array<i64: 1, 128>}, {transform_indices = @transform_3, window_bounds = array<i64: 8, 128>}]} {
    %c0 = arith.constant 0 : index
    %c0_0 = arith.constant 0 : index
    %0 = vector.load %arg1[%c0, %c0_0] : memref<8x128xf32, #tpu.memory_space<vmem>>, vector<8x128xf32>
    %c0_1 = arith.constant 0 : index
    %c0_2 = arith.constant 0 : index
    %1 = vector.load %arg2[%c0_1, %c0_2] : memref<128x128xf32, #tpu.memory_space<vmem>>, vector<128x128xf32>
    %cst = arith.constant dense<0.000000e+00> : vector<8x128xf32>
    %2 = tpu.matmul %0, %1, %cst {dimension_numbers = #tpu.dot_dimension_numbers<[1], [0], [0], [1], [0, 0, 1, 1], [], []>} : vector<8x128xf32>, vector<128x128xf32>, vector<8x128xf32> -> vector<8x128xf32>
    %c0_3 = arith.constant 0 : index
    %c0_4 = arith.constant 0 : index
    %3 = vector.load %arg3[%c0_3, %c0_4] : memref<1x128xf32, #tpu.memory_space<vmem>>, vector<1x128xf32>
    %4 = vector.broadcast %3 : vector<1x128xf32> to vector<8x128xf32>
    %5 = arith.addf %2, %4 : vector<8x128xf32>
    %cst_5 = arith.constant 0.000000e+00 : f32
    %6 = vector.broadcast %cst_5 : f32 to vector<8x128xf32>
    %7 = arith.subf %6, %5 : vector<8x128xf32>
    %8 = math.exp %7 : vector<8x128xf32>
    %cst_6 = arith.constant 1.000000e+00 : f32
    %9 = vector.broadcast %cst_6 : f32 to vector<8x128xf32>
    %10 = arith.addf %9, %8 : vector<8x128xf32>
    %cst_7 = arith.constant 1.000000e+00 : f32
    %11 = vector.broadcast %cst_7 : f32 to vector<8x128xf32>
    %12 = arith.divf %11, %10 : vector<8x128xf32>
    %c0_8 = arith.constant 0 : index
    %c0_9 = arith.constant 0 : index
    %13 = vector.load %arg4[%c0_8, %c0_9] : memref<8x128xf32, #tpu.memory_space<vmem>>, vector<8x128xf32>
    tpu.vector_store %arg4[%c0_8, %c0_9], %12 {strides = array<i32>} : memref<8x128xf32, #tpu.memory_space<vmem>>, vector<8x128xf32>,
    return
  }
  func.func @transform_0(%arg0: i32) -> (i32, i32) {
    %c0_i32 = arith.constant 0 : i32
    %c0_i32_0 = arith.constant 0 : i32
    return %arg0, %c0_i32 : i32, i32
  }
  func.func @transform_1(%arg0: i32) -> (i32, i32) {
    %c0_i32 = arith.constant 0 : i32
    %c0_i32_0 = arith.constant 0 : i32
    %c0_i32_1 = arith.constant 0 : i32
    return %c0_i32, %c0_i32_0 : i32, i32
  }
  func.func @transform_2(%arg0: i32) -> (i32, i32) {
    %c0_i32 = arith.constant 0 : i32
    %c0_i32_0 = arith.constant 0 : i32
    %c0_i32_1 = arith.constant 0 : i32
    return %c0_i32, %c0_i32_0 : i32, i32
  }
  func.func @transform_3(%arg0: i32) -> (i32, i32) {
    %c0_i32 = arith.constant 0 : i32
    %c0_i32_0 = arith.constant 0 : i32
    return %arg0, %c0_i32 : i32, i32
  }
}

</mosaic_0001>

<bundles_post_ra>
// kernel: tpu_custom_call.1
= control target key start
LH: loop header
LB: loop body
LE: loop exit
PB: predicated region body
PF: predicated region fallthrough
CT: control target
= control target key end

     0   :  { %8 = vsyncpa [#allocation3], 0  ;;  %s393_s0 = inlined_call_operand.hbm [shape: f32[8,128], index: 0, kind: input, shape index: {}]   ;;  %s394_s1 = inlined_call_operand.hbm [shape: f32[128,128], index: 1, kind: input, shape index: {}]   ;;  %s395_s2 = inlined_call_operand.vmem [shape: f32[1,128], index: 2, kind: input, shape index: {}]   ;;  %s396_s3 = inlined_call_operand.hbm [shape: f32[8,128], index: 3, kind: output, shape index: {}]  }
   0x1   :  { %9 = vsyncpa [#allocation6], 0 }
   0x2   :  { %10 = vsyncpa [#allocation4], 0  ;;  %s319_s12 = smov [#allocation2]   ;;  %s320_s14 = smov [#allocation5]  }
   0x3   :  { %s17_s13 = sshll.u32 %s319_s12, 4  ;;  %s26_s15 = sshll.u32 %s320_s14, 4  ;;  %s18_s13 = int_to_ptr.vmem [resolvable:$true] %s17_s13  ;;  %s347_s15 = int_to_ptr.vmem [resolvable:$true] %s26_s15 }
   0x4   :  { %s247_s18 = scalar_lea.hbm %s393_s0, 128 }
   0x5   :  { %p248_p0 = scmp.ne.s32.totalorder %s393_s0, %s247_s18  ;;  %p251_p1 = scmp.lt.u32.totalorder %s247_s18, %s393_s0 }
   0x7   :  { %p253_p2 = pnand %p251_p1, %p248_p0 }
   0x9   :  { %256 = shalt.err (!%p253_p2)
}
   0xa   :  { %s257_s23 = scalar_lea.vmem %s18_s13, 128  ;;  %p262_p4 = scmp.lt.s32.totalorder %s18_s13, %s18_s13 }
   0xb   :  { %p258_p3 = scmp.ne.s32.totalorder %s18_s13, %s257_s23  ;;  %p263_p5 = scmp.lt.s32.totalorder %s257_s23, %s257_s23 }
   0xd   :  { %p264_p6 = por %p263_p5, %p262_p4 }
   0xf   :  { %p265_p7 = pnand %p264_p6, %p258_p3 }
  0x11   :  { %268 = shalt.err (!%p265_p7)
}
  0x12   :  { %20 = dma.hbm_to_vmem [thread:$0]  %s393_s0, 128, %s18_s13, [#allocation3]  }
  0x13   :  { %s269_s28 = scalar_lea.hbm %s394_s1, 2048 }
  0x14   :  { %p270_p8 = scmp.ne.s32.totalorder %s394_s1, %s269_s28  ;;  %p273_p9 = scmp.lt.u32.totalorder %s269_s28, %s394_s1 }
  0x16   :  { %p275_p10 = pnand %p273_p9, %p270_p8 }
  0x18   :  { %278 = shalt.err (!%p275_p10)
}
  0x19   :  { %s279_s6 = scalar_lea.vmem %s347_s15, 2048  ;;  %p284_p12 = scmp.lt.s32.totalorder %s347_s15, %s347_s15 }
  0x1a   :  { %p280_p11 = scmp.ne.s32.totalorder %s347_s15, %s279_s6  ;;  %p285_p13 = scmp.lt.s32.totalorder %s279_s6, %s279_s6 }
  0x1c   :  { %p286_p0 = por %p285_p13, %p284_p12 }
  0x1e   :  { %p287_p1 = pnand %p286_p0, %p280_p11 }
  0x20   :  { %290 = shalt.err (!%p287_p1)
}
  0x21   :  { %s321_s0 = smov 128   ;;  %s322_s7 = smov 8  }
  0x22   :  { %32 = dma.hbm_to_vmem [thread:$0]  %s394_s1, 2048, %s347_s15, [#allocation6], %s321_s0, %s321_s0, %s322_s7  }
  0x23   :  { %313 = dma.done.wait [#allocation3], 128  }
  0x24   :  { %314 = vsyncadd [#allocation3], 4294967168 }
  0x25   :  { %315 = dma.done.wait [#allocation6], 2048  }
  0x26   :  { %316 = vsyncadd [#allocation6], 4294965248  ;;  %v323_v0 = vmov 0.0|0.0   ;;  %vm324_vm0 = vmmov 0   ;;  %v325_v1 = vmov 0.0   ;;  %v42_v2 = vld [vmem:[#allocation5] sm:$0xff] }
  0x27   :  { %211 = vmatprep.subr.bf16.mxu0 %v323_v0  ;;  %208 = vmatprep.mubr.msk.f32.mxu0 %vm324_vm0, %v325_v1  ;;  %v43_v3 = vld [vmem:[#allocation5 + $0x8] sm:$0xff]  ;;  %v44_v4 = vld [vmem:[#allocation5 + $0x10] sm:$0xff]  ;;  %v45_v6 = vld [vmem:[#allocation5 + $0x18] sm:$0xff]  ;;  %s326_s11 = smov [#allocation7]  }
  0x28   :  { %v212_v5 = vpack.c.bf16 %v43_v3, %v42_v2  ;;  %v215_v7 = vpack.c.bf16 %v45_v6, %v44_v4  ;;  %v46_v8 = vld [vmem:[#allocation5 + $0x20] sm:$0xff]  ;;  %v47_v9 = vld [vmem:[#allocation5 + $0x28] sm:$0xff]  ;;  %v48_v11 = vld [vmem:[#allocation5 + $0x30] sm:$0xff]  ;;  %s148_s12 = sshll.u32 %s326_s11, 4  ;;  %s149_s12 = int_to_ptr.vmem [resolvable:$true] %s148_s12 }
  0x29   :  { %v218_v10 = vpack.c.bf16 %v47_v9, %v46_v8  ;;  %v49_v12 = vld [vmem:[#allocation5 + $0x38] sm:$0xff]  ;;  %v50_v14 = vld [vmem:[#allocation5 + $0x40] sm:$0xff]  ;;  %v51_v15 = vld [vmem:[#allocation5 + $0x48] sm:$0xff]  ;;  %s291_s13 = scalar_lea.vmem %s149_s12, 128  ;;  %p296_p3 = scmp.lt.s32.totalorder %s149_s12, %s149_s12 }
  0x2a   :  { %213 = vmatpush3.bf16.msra.mxu0 %v212_v5  ;;  %v221_v13 = vpack.c.bf16 %v49_v12, %v48_v11  ;;  %v224_v16 = vpack.c.bf16 %v51_v15, %v50_v14  ;;  %v52_v17 = vld [vmem:[#allocation5 + $0x50] sm:$0xff]  ;;  %v53_v18 = vld [vmem:[#allocation5 + $0x58] sm:$0xff]  ;;  %v54_v20 = vld [vmem:[#allocation5 + $0x60] sm:$0xff]  ;;  %p292_p2 = scmp.ne.s32.totalorder %s149_s12, %s291_s13  ;;  %p297_p4 = scmp.lt.s32.totalorder %s291_s13, %s291_s13 }
  0x2b   :  { %214 = vmatprep.subr.bf16.mxu0 %v323_v0  ;;  %v227_v19 = vpack.c.bf16 %v53_v18, %v52_v17  ;;  %v55_v21 = vld [vmem:[#allocation5 + $0x68] sm:$0xff]  ;;  %v56_v23 = vld [vmem:[#allocation5 + $0x70] sm:$0xff]  ;;  %v57_v24 = vld [vmem:[#allocation5 + $0x78] sm:$0xff] }
  0x2c   :  { %v230_v22 = vpack.c.bf16 %v55_v21, %v54_v20  ;;  %v233_v25 = vpack.c.bf16 %v57_v24, %v56_v23  ;;  %v41_v26 = vld [vmem:[#allocation2] sm:$0xff]  ;;  %p298_p5 = por %p297_p4, %p296_p3 }
  0x2d   :  { %v158_v27 = vld [vmem:[%s395_s2] ss:$0 sm:$0xff] }
  0x2e   :  { %216 = vmatpush3.bf16.msra.mxu0 %v215_v7  ;;  %p299_p6 = pnand %p298_p5, %p292_p2 }
  0x2f   :  { %217 = vmatprep.subr.bf16.mxu0 %v323_v0 }
  0x32   :  { %219 = vmatpush3.bf16.msra.mxu0 %v218_v10 }
  0x33   :  { %220 = vmatprep.subr.bf16.mxu0 %v323_v0 }
  0x36   :  { %222 = vmatpush3.bf16.msra.mxu0 %v221_v13 }
  0x37   :  { %223 = vmatprep.subr.bf16.mxu0 %v323_v0 }
  0x3a   :  { %225 = vmatpush3.bf16.msra.mxu0 %v224_v16 }
  0x3b   :  { %226 = vmatprep.subr.bf16.mxu0 %v323_v0 }
  0x3e   :  { %228 = vmatpush3.bf16.msra.mxu0 %v227_v19 }
  0x3f   :  { %229 = vmatprep.subr.bf16.mxu0 %v323_v0 }
  0x42   :  { %231 = vmatpush3.bf16.msra.mxu0 %v230_v22 }
  0x43   :  { %232 = vmatprep.subr.bf16.mxu0 %v323_v0 }
  0x46   :  { %234 = vmatpush3.bf16.msra.mxu0 %v233_v25 }
  0x49   :  { %209 = vmatmul.mubr.f32.vlgmr.msra.gmra.mrb[0].mxu0 %v41_v26 }
 0x11c   :  { %v131_v28 = vpop.f32.mrb[0].mxu0 }
 0x11d   :  { %v132_v29 = vadd.f32 %v158_v27, %v131_v28  ;;  %v210_v30 = vpop.f32.mrb[1].mxu0 }
 0x11f   :  { %v135_v31 = vsub.f32 0.0, %v132_v29 }
 0x121   :  { %v136_v32 = vmul.f32 1.442695, %v135_v31 }
 0x123   :  { %243 = vpow2.f32 %v136_v32 }
 0x12d   :  { %v244_v33 = vpop.eup %243 }
 0x12e   :  { %v138_v34 = vadd.f32 1.0, %v244_v33 }
 0x130   :  { %245 = vrcp.f32 %v138_v34 }
 0x13a   :  { %v246_v35 = vpop.eup %245 }
 0x13b   :  { %141 = vst [vmem:[#allocation7] sm:$0xff] %v246_v35 }
 0x13c   :  { %302 = shalt.err (!%p299_p6)
}
 0x13d   :  { %s303_s15 = scalar_lea.hbm %s396_s3, 128 }
 0x13e   :  { %p304_p7 = scmp.ne.s32.totalorder %s396_s3, %s303_s15  ;;  %p307_p8 = scmp.lt.u32.totalorder %s303_s15, %s396_s3 }
 0x140   :  { %p309_p9 = pnand %p307_p8, %p304_p7 }
 0x142   :  { %312 = shalt.err (!%p309_p9)
}
 0x143   :  { %151 = dma.vmem_to_hbm [thread:$0]  %s149_s12, 128, %s396_s3, [#allocation4]  }
 0x144   :  { %317 = dma.done.wait [#allocation4], 128  }
 0x145   :  { %318 = vsyncadd [#allocation4], 4294967168 }
 0x146   :  { %155 = vsyncpa [#allocation3], 1 }
 0x147   :  { %156 = vsyncpa [#allocation6], 1 }
 0x148   :  { %157 = vsyncpa [#allocation4], 1 }

</bundles_post_ra>
